<compile_context>
chip_gen: v5e
topology: v5e:2x2
jax: 0.10.0
libtpu: 0.0.40
codegen_flags: <defaults>
</compile_context>

<pallas_src>
import jax
import jax.numpy as jnp
from jax.experimental import pallas as pl
from jax.experimental.pallas import tpu as pltpu

BETA = 0.1


def _agu_entropy_kernel(prob_ref, label_ref, out_ref, nll_acc, ent_acc, cnt_acc):
    """Processes a (TM, C) tile of logits; accumulates per-row partials in VMEM."""
    j = pl.program_id(1)

    @pl.when(j == 0)
    def _():
        nll_acc[...] = jnp.zeros_like(nll_acc)
        ent_acc[...] = jnp.zeros_like(ent_acc)
        cnt_acc[...] = jnp.zeros_like(cnt_acc)

    x = prob_ref[...].astype(jnp.float32)                 # (TM, C) logits

    # numerically-stable softmax pieces (one exp per element, no logp tensor)
    xmax = jnp.max(x, axis=1, keepdims=True)              # (TM, 1)
    z = x - xmax
    e = jnp.exp(z)                                        # (TM, C)
    s = jnp.sum(e, axis=1, keepdims=True)                 # (TM, 1)
    lse = jnp.log(s)                                      # (TM, 1)
    sum_ez = jnp.sum(e * z, axis=1, keepdims=True)        # (TM, 1)

    # per-row entropy:  -(p * logp).sum = lse - sum(e*z)/s
    entropy = lse - sum_ez / s                            # (TM, 1)

    # z[n, label[n]] via one-hot select (also gives the NLL term)
    lbl = label_ref[...]                                  # (TM, 1) int32
    col = jax.lax.broadcasted_iota(jnp.int32, x.shape, 1)
    onehot = (col == lbl).astype(jnp.float32)             # (TM, C)
    z_lbl = jnp.sum(onehot * z, axis=1, keepdims=True)    # (TM, 1)

    # NLL term: -logp[n, label] = lse - z[n, label]
    nll_terms = lse - z_lbl                               # (TM, 1)

    # misclassified  <=>  x[n,label] < max_c x[n,c]  <=>  z[n,label] < 0
    # (tie-break vs. torch first-index argmax differs only on exact float ties)
    mask = (z_lbl < 0.0).astype(jnp.float32)              # (TM, 1)

    # per-row partial accumulation (no per-step sublane reduce)
    nll_acc[...] += nll_terms
    ent_acc[...] += entropy * mask
    cnt_acc[...] += mask

    @pl.when(j == pl.num_programs(1) - 1)
    def _():
        nll_tot = jnp.sum(nll_acc[...], axis=0, keepdims=True)   # (1, 1)
        ent_tot = jnp.sum(ent_acc[...], axis=0, keepdims=True)
        cnt_tot = jnp.sum(cnt_acc[...], axis=0, keepdims=True)
        row = jax.lax.broadcasted_iota(jnp.int32, (8, 128), 0)
        lane = jax.lax.broadcasted_iota(jnp.int32, (8, 128), 1)
        res = jnp.where((row == 0) & (lane == 0), nll_tot,
              jnp.where((row == 0) & (lane == 1), ent_tot,
              jnp.where((row == 0) & (lane == 2), cnt_tot,
                        jnp.zeros((8, 128), jnp.float32))))
        out_ref[0] = res


def agu_entropy_loss(prob, label, beta=BETA, tm=None):
    """prob: (N, C) float logits, label: (N,) int.  Returns (loss, entropy)."""
    N, C = prob.shape
    assert N % 8 == 0, "batch size must be a multiple of 8"
    label2d = label.astype(jnp.int32).reshape(N, 1)

    itemsize = jnp.dtype(prob.dtype).itemsize
    sub = 16 if (itemsize < 4 and N % 16 == 0) else 8     # bf16 rows pack by 16

    if tm is None:
        # ~20 MiB budget for the double-buffered logits tile, capped at 1024 rows.
        budget = 20 * 1024 * 1024
        cap = max(sub, min(1024, budget // (2 * C * itemsize)))
        cap = max(sub, (cap // sub) * sub)
        tm = sub
        t = cap
        while t >= sub:
            if N % t == 0:
                tm = t
                break
            t -= sub
    else:
        assert tm % sub == 0 and N % tm == 0

    steps_total = N // tm
    ncores = 2 if (steps_total % 2 == 0 and steps_total >= 2) else 1
    steps = steps_total // ncores

    out = pl.pallas_call(
        _agu_entropy_kernel,
        out_shape=jax.ShapeDtypeStruct((ncores, 8, 128), jnp.float32),
        grid_spec=pltpu.PrefetchScalarGridSpec(
            num_scalar_prefetch=0,
            grid=(ncores, steps),
            in_specs=[
                pl.BlockSpec((tm, C), lambda c, j: (c * steps + j, 0)),
                pl.BlockSpec((tm, 1), lambda c, j: (c * steps + j, 0)),
            ],
            out_specs=pl.BlockSpec((1, 8, 128), lambda c, j: (c, 0, 0)),
            scratch_shapes=[
                pltpu.VMEM((tm, 1), jnp.float32),   # per-row NLL partials
                pltpu.VMEM((tm, 1), jnp.float32),   # per-row masked entropy partials
                pltpu.VMEM((tm, 1), jnp.float32),   # per-row mask counts
            ],
        ),
        compiler_params=pltpu.CompilerParams(
            dimension_semantics=("parallel", "arbitrary"),
            vmem_limit_bytes=32 * 1024 * 1024,
        ),
    )(prob, label2d)

    totals = jnp.sum(out[:, 0, :3], axis=0)     # cross-core reduce of partials
    nll = totals[0] / N
    # mean over masked rows (NaN if no misclassified rows, same as torch mean([]))
    entropy = totals[1] / totals[2]
    loss = nll - beta * entropy
    return loss, entropy


def _reference(prob, label, beta=BETA):
    logp = jax.nn.log_softmax(prob, axis=1)
    mask = jnp.argmax(logp, axis=1) != label
    ent_all = -jnp.sum(jnp.exp(logp) * logp, axis=1)
    entropy = jnp.sum(jnp.where(mask, ent_all, 0.0)) / jnp.sum(mask)
    nll = -jnp.mean(jnp.take_along_axis(logp, label[:, None], axis=1))
    return nll - beta * entropy, entropy


if __name__ == "__main__":
    key = jax.random.PRNGKey(0)
    k1, k2 = jax.random.split(key)

    # Small classification-head shape: batch=16, classes=10.
    N, C = 16, 10
    prob = jax.random.normal(k1, (N, C), dtype=jnp.float32)
    label = jax.random.randint(k2, (N,), 0, C, dtype=jnp.int32)

    loss, entropy = agu_entropy_loss(prob, label)
    jax.block_until_ready((loss, entropy))
    ref_loss, ref_ent = _reference(prob, label)
    assert jnp.allclose(loss, ref_loss, atol=1e-5, rtol=1e-5), (loss, ref_loss)
    assert jnp.allclose(entropy, ref_ent, atol=1e-5, rtol=1e-5), (entropy, ref_ent)

    # Exercise the multi-tile / per-core-partial path (grid = (2, 4), tm=8).
    k3, k4 = jax.random.split(k2)
    N2, C2 = 64, 10
    prob2 = jax.random.normal(k3, (N2, C2), dtype=jnp.float32)
    label2 = jax.random.randint(k4, (N2,), 0, C2, dtype=jnp.int32)
    loss2, ent2 = agu_entropy_loss(prob2, label2, tm=8)
    jax.block_until_ready((loss2, ent2))
    ref_loss2, ref_ent2 = _reference(prob2, label2)
    assert jnp.allclose(loss2, ref_loss2, atol=1e-5, rtol=1e-5), (loss2, ref_loss2)
    assert jnp.allclose(ent2, ref_ent2, atol=1e-5, rtol=1e-5), (ent2, ref_ent2)

    print("KERNEL_OK")
</pallas_src>

<mosaic_0001>
module attributes {stable_mosaic.version = 11 : i64} {
  func.func @_agu_entropy_kernel(%arg0: i32, %arg1: i32, %arg2: memref<16x10xf32, #tpu.memory_space<vmem>>, %arg3: memref<16x1xi32, #tpu.memory_space<vmem>>, %arg4: memref<1x8x128xf32, #tpu.memory_space<vmem>>, %arg5: memref<16x1xf32, #tpu.memory_space<vmem>>, %arg6: memref<16x1xf32, #tpu.memory_space<vmem>>, %arg7: memref<16x1xf32, #tpu.memory_space<vmem>>) attributes {dimension_semantics = [#tpu.dimension_semantics<parallel>, #tpu.dimension_semantics<arbitrary>], iteration_bounds = array<i64: 1, 1>, scalar_prefetch = 0 : i64, scratch_operands = 3 : i64, tpu.core_type = #tpu.core_type<tc>, window_params = [{transform_indices = @transform_0, window_bounds = array<i64: 16, 10>}, {transform_indices = @transform_1, window_bounds = array<i64: 16, 1>}, {transform_indices = @transform_2, window_bounds = array<i64: 1, 8, 128>}]} {
    %c0_i32 = arith.constant 0 : i32
    %0 = arith.cmpi eq, %arg1, %c0_i32 : i32
    %1 = arith.extui %0 : i1 to i32
    %c0_i32_0 = arith.constant 0 : i32
    %2 = arith.cmpi ne, %1, %c0_i32_0 : i32
    scf.if %2 {
      %cst_22 = arith.constant 0.000000e+00 : f32
      %44 = vector.broadcast %cst_22 : f32 to vector<16x1xf32>
      %c0_23 = arith.constant 0 : index
      %c0_24 = arith.constant 0 : index
      %45 = vector.load %arg5[%c0_23, %c0_24] : memref<16x1xf32, #tpu.memory_space<vmem>>, vector<16x1xf32>
      tpu.vector_store %arg5[%c0_23, %c0_24], %44 {strides = array<i32>} : memref<16x1xf32, #tpu.memory_space<vmem>>, vector<16x1xf32>,
      %cst_25 = arith.constant 0.000000e+00 : f32
      %46 = vector.broadcast %cst_25 : f32 to vector<16x1xf32>
      %c0_26 = arith.constant 0 : index
      %c0_27 = arith.constant 0 : index
      %47 = vector.load %arg6[%c0_26, %c0_27] : memref<16x1xf32, #tpu.memory_space<vmem>>, vector<16x1xf32>
      tpu.vector_store %arg6[%c0_26, %c0_27], %46 {strides = array<i32>} : memref<16x1xf32, #tpu.memory_space<vmem>>, vector<16x1xf32>,
      %cst_28 = arith.constant 0.000000e+00 : f32
      %48 = vector.broadcast %cst_28 : f32 to vector<16x1xf32>
      %c0_29 = arith.constant 0 : index
      %c0_30 = arith.constant 0 : index
      %49 = vector.load %arg7[%c0_29, %c0_30] : memref<16x1xf32, #tpu.memory_space<vmem>>, vector<16x1xf32>
      tpu.vector_store %arg7[%c0_29, %c0_30], %48 {strides = array<i32>} : memref<16x1xf32, #tpu.memory_space<vmem>>, vector<16x1xf32>,
    } else {
    }
    %c0 = arith.constant 0 : index
    %c0_1 = arith.constant 0 : index
    %3 = vector.load %arg2[%c0, %c0_1] : memref<16x10xf32, #tpu.memory_space<vmem>>, vector<16x10xf32>
    %cst = arith.constant dense<0xFF800000> : vector<16xf32>
    %4 = vector.multi_reduction <maximumf>, %3, %cst [1] : vector<16x10xf32> to vector<16xf32>
    %5 = vector.shape_cast %4 : vector<16xf32> to vector<16x1xf32>
    %6 = vector.broadcast %5 : vector<16x1xf32> to vector<16x10xf32>
    %7 = arith.subf %3, %6 : vector<16x10xf32>
    %8 = math.exp %7 : vector<16x10xf32>
    %cst_2 = arith.constant dense<0.000000e+00> : vector<16xf32>
    %9 = vector.multi_reduction <add>, %8, %cst_2 [1] : vector<16x10xf32> to vector<16xf32>
    %10 = vector.shape_cast %9 : vector<16xf32> to vector<16x1xf32>
    %11 = math.log %10 : vector<16x1xf32>
    %12 = arith.mulf %8, %7 : vector<16x10xf32>
    %cst_3 = arith.constant dense<0.000000e+00> : vector<16xf32>
    %13 = vector.multi_reduction <add>, %12, %cst_3 [1] : vector<16x10xf32> to vector<16xf32>
    %14 = vector.shape_cast %13 : vector<16xf32> to vector<16x1xf32>
    %15 = arith.divf %14, %10 : vector<16x1xf32>
    %16 = arith.subf %11, %15 : vector<16x1xf32>
    %c0_4 = arith.constant 0 : index
    %c0_5 = arith.constant 0 : index
    %17 = vector.load %arg3[%c0_4, %c0_5] : memref<16x1xi32, #tpu.memory_space<vmem>>, vector<16x1xi32>
    %18 = tpu.iota {dimensions = array<i32: 1>} : vector<16x10xi32>
    %19 = vector.broadcast %17 : vector<16x1xi32> to vector<16x10xi32>
    %20 = arith.cmpi eq, %18, %19 : vector<16x10xi32>
    %21 = arith.extui %20 : vector<16x10xi1> to vector<16x10xi32>
    %22 = arith.sitofp %21 : vector<16x10xi32> to vector<16x10xf32>
    %23 = arith.mulf %22, %7 : vector<16x10xf32>
    %cst_6 = arith.constant dense<0.000000e+00> : vector<16xf32>
    %24 = vector.multi_reduction <add>, %23, %cst_6 [1] : vector<16x10xf32> to vector<16xf32>
    %25 = vector.shape_cast %24 : vector<16xf32> to vector<16x1xf32>
    %26 = arith.subf %11, %25 : vector<16x1xf32>
    %cst_7 = arith.constant 0.000000e+00 : f32
    %27 = vector.broadcast %cst_7 : f32 to vector<16x1xf32>
    %28 = arith.cmpf olt, %25, %27 : vector<16x1xf32>
    %29 = arith.extui %28 : vector<16x1xi1> to vector<16x1xi32>
    %30 = arith.sitofp %29 : vector<16x1xi32> to vector<16x1xf32>
    %c0_8 = arith.constant 0 : index
    %c0_9 = arith.constant 0 : index
    %31 = vector.load %arg5[%c0_8, %c0_9] : memref<16x1xf32, #tpu.memory_space<vmem>>, vector<16x1xf32>
    %32 = arith.addf %31, %26 : vector<16x1xf32>
    %c0_10 = arith.constant 0 : index
    %c0_11 = arith.constant 0 : index
    %33 = vector.load %arg5[%c0_10, %c0_11] : memref<16x1xf32, #tpu.memory_space<vmem>>, vector<16x1xf32>
    tpu.vector_store %arg5[%c0_10, %c0_11], %32 {strides = array<i32>} : memref<16x1xf32, #tpu.memory_space<vmem>>, vector<16x1xf32>,
    %c0_12 = arith.constant 0 : index
    %c0_13 = arith.constant 0 : index
    %34 = vector.load %arg6[%c0_12, %c0_13] : memref<16x1xf32, #tpu.memory_space<vmem>>, vector<16x1xf32>
    %35 = arith.mulf %16, %30 : vector<16x1xf32>
    %36 = arith.addf %34, %35 : vector<16x1xf32>
    %c0_14 = arith.constant 0 : index
    %c0_15 = arith.constant 0 : index
    %37 = vector.load %arg6[%c0_14, %c0_15] : memref<16x1xf32, #tpu.memory_space<vmem>>, vector<16x1xf32>
    tpu.vector_store %arg6[%c0_14, %c0_15], %36 {strides = array<i32>} : memref<16x1xf32, #tpu.memory_space<vmem>>, vector<16x1xf32>,
    %c0_16 = arith.constant 0 : index
    %c0_17 = arith.constant 0 : index
    %38 = vector.load %arg7[%c0_16, %c0_17] : memref<16x1xf32, #tpu.memory_space<vmem>>, vector<16x1xf32>
    %39 = arith.addf %38, %30 : vector<16x1xf32>
    %c0_18 = arith.constant 0 : index
    %c0_19 = arith.constant 0 : index
    %40 = vector.load %arg7[%c0_18, %c0_19] : memref<16x1xf32, #tpu.memory_space<vmem>>, vector<16x1xf32>
    tpu.vector_store %arg7[%c0_18, %c0_19], %39 {strides = array<i32>} : memref<16x1xf32, #tpu.memory_space<vmem>>, vector<16x1xf32>,
    %c0_i32_20 = arith.constant 0 : i32
    %41 = arith.cmpi eq, %arg1, %c0_i32_20 : i32
    %42 = arith.extui %41 : i1 to i32
    %c0_i32_21 = arith.constant 0 : i32
    %43 = arith.cmpi ne, %42, %c0_i32_21 : i32
    scf.if %43 {
      %c0_22 = arith.constant 0 : index
      %c0_23 = arith.constant 0 : index
      %44 = vector.load %arg5[%c0_22, %c0_23] : memref<16x1xf32, #tpu.memory_space<vmem>>, vector<16x1xf32>
      %cst_24 = arith.constant dense<0.000000e+00> : vector<1xf32>
      %45 = vector.multi_reduction <add>, %44, %cst_24 [0] : vector<16x1xf32> to vector<1xf32>
      %46 = vector.shape_cast %45 : vector<1xf32> to vector<1x1xf32>
      %c0_25 = arith.constant 0 : index
      %c0_26 = arith.constant 0 : index
      %47 = vector.load %arg6[%c0_25, %c0_26] : memref<16x1xf32, #tpu.memory_space<vmem>>, vector<16x1xf32>
      %cst_27 = arith.constant dense<0.000000e+00> : vector<1xf32>
      %48 = vector.multi_reduction <add>, %47, %cst_27 [0] : vector<16x1xf32> to vector<1xf32>
      %49 = vector.shape_cast %48 : vector<1xf32> to vector<1x1xf32>
      %c0_28 = arith.constant 0 : index
      %c0_29 = arith.constant 0 : index
      %50 = vector.load %arg7[%c0_28, %c0_29] : memref<16x1xf32, #tpu.memory_space<vmem>>, vector<16x1xf32>
      %cst_30 = arith.constant dense<0.000000e+00> : vector<1xf32>
      %51 = vector.multi_reduction <add>, %50, %cst_30 [0] : vector<16x1xf32> to vector<1xf32>
      %52 = vector.shape_cast %51 : vector<1xf32> to vector<1x1xf32>
      %53 = tpu.iota {dimensions = array<i32: 0>} : vector<8x128xi32>
      %54 = tpu.iota {dimensions = array<i32: 1>} : vector<8x128xi32>
      %c0_i32_31 = arith.constant 0 : i32
      %55 = vector.broadcast %c0_i32_31 : i32 to vector<8x128xi32>
      %56 = arith.cmpi eq, %53, %55 : vector<8x128xi32>
      %c0_i32_32 = arith.constant 0 : i32
      %57 = vector.broadcast %c0_i32_32 : i32 to vector<8x128xi32>
      %58 = arith.cmpi eq, %54, %57 : vector<8x128xi32>
      %59 = arith.andi %56, %58 : vector<8x128xi1>
      %c0_i32_33 = arith.constant 0 : i32
      %60 = vector.broadcast %c0_i32_33 : i32 to vector<8x128xi32>
      %61 = arith.cmpi eq, %53, %60 : vector<8x128xi32>
      %c1_i32 = arith.constant 1 : i32
      %62 = vector.broadcast %c1_i32 : i32 to vector<8x128xi32>
      %63 = arith.cmpi eq, %54, %62 : vector<8x128xi32>
      %64 = arith.andi %61, %63 : vector<8x128xi1>
      %c0_i32_34 = arith.constant 0 : i32
      %65 = vector.broadcast %c0_i32_34 : i32 to vector<8x128xi32>
      %66 = arith.cmpi eq, %53, %65 : vector<8x128xi32>
      %c2_i32 = arith.constant 2 : i32
      %67 = vector.broadcast %c2_i32 : i32 to vector<8x128xi32>
      %68 = arith.cmpi eq, %54, %67 : vector<8x128xi32>
      %69 = arith.andi %66, %68 : vector<8x128xi1>
      %cst_35 = arith.constant 0.000000e+00 : f32
      %70 = vector.broadcast %cst_35 : f32 to vector<8x128xf32>
      %71 = vector.shape_cast %52 : vector<1x1xf32> to vector<1x1xf32>
      %72 = vector.broadcast %71 : vector<1x1xf32> to vector<8x128xf32>
      %73 = arith.select %69, %72, %70 : vector<8x128xi1>, vector<8x128xf32>
      %74 = vector.shape_cast %49 : vector<1x1xf32> to vector<1x1xf32>
      %75 = vector.broadcast %74 : vector<1x1xf32> to vector<8x128xf32>
      %76 = arith.select %64, %75, %73 : vector<8x128xi1>, vector<8x128xf32>
      %77 = vector.shape_cast %46 : vector<1x1xf32> to vector<1x1xf32>
      %78 = vector.broadcast %77 : vector<1x1xf32> to vector<8x128xf32>
      %79 = arith.select %59, %78, %76 : vector<8x128xi1>, vector<8x128xf32>
      %c0_36 = arith.constant 0 : index
      %c0_37 = arith.constant 0 : index
      %c0_38 = arith.constant 0 : index
      %80 = vector.load %arg4[%c0_36, %c0_37, %c0_38] : memref<1x8x128xf32, #tpu.memory_space<vmem>>, vector<1x8x128xf32>
      %81 = vector.shape_cast %80 : vector<1x8x128xf32> to vector<8x128xf32>
      %82 = vector.shape_cast %79 : vector<8x128xf32> to vector<1x8x128xf32>
      tpu.vector_store %arg4[%c0_36, %c0_37, %c0_38], %82 {strides = array<i32>} : memref<1x8x128xf32, #tpu.memory_space<vmem>>, vector<1x8x128xf32>,
    } else {
    }
    return
  }
  func.func @transform_0(%arg0: i32, %arg1: i32) -> (i32, i32) {
    %c1_i32 = arith.constant 1 : i32
    %0 = arith.muli %arg0, %c1_i32 : i32
    %1 = arith.addi %0, %arg1 : i32
    %c0_i32 = arith.constant 0 : i32
    %c0_i32_0 = arith.constant 0 : i32
    return %1, %c0_i32 : i32, i32
  }
  func.func @transform_1(%arg0: i32, %arg1: i32) -> (i32, i32) {
    %c1_i32 = arith.constant 1 : i32
    %0 = arith.muli %arg0, %c1_i32 : i32
    %1 = arith.addi %0, %arg1 : i32
    %c0_i32 = arith.constant 0 : i32
    %c0_i32_0 = arith.constant 0 : i32
    return %1, %c0_i32 : i32, i32
  }
  func.func @transform_2(%arg0: i32, %arg1: i32) -> (i32, i32, i32) {
    %c0_i32 = arith.constant 0 : i32
    %c0_i32_0 = arith.constant 0 : i32
    %c0_i32_1 = arith.constant 0 : i32
    return %arg0, %c0_i32, %c0_i32_0 : i32, i32, i32
  }
}

</mosaic_0001>

<bundles_post_ra>
// kernel: tpu_custom_call.1
= control target key start
LH: loop header
LB: loop body
LE: loop exit
PB: predicated region body
PF: predicated region fallthrough
CT: control target
= control target key end

     0   :  { %vm69_vm0 = vcmask 80896   ;;  %v325_v2 = vmov 0   ;;  %s403_s0 = inlined_call_operand.vmem [shape: f32[16,10], index: 0, kind: input, shape index: {}]   ;;  %s404_s1 = inlined_call_operand.vmem [shape: s32[16,1], index: 1, kind: input, shape index: {}]   ;;  %s405_s2 = inlined_call_operand.hbm [shape: f32[1,8,128], index: 2, kind: output, shape index: {}]  }
   0x1   :  { %v67_v0 = vld [vmem:[%s403_s0] sm:$0xff]  ;;  %284 = vset.pattern.permute.xlu1 %v325_v2  ;;  %285 = vset.pattern.permute.xlu2 %v325_v2 }
   0x2   :  { %v132_v1 = vld [vmem:[%s404_s1] sm:$0xff]  ;;  %v70_v3 = vsel %vm69_vm0, %v67_v0, -inf }
   0x3   :  { %7 = vsyncpa [#allocation6], 0  ;;  %71 = vmax.xlane.f32.xlu0 %v70_v3  ;;  %137 = vperm.xlu1 %284, %v132_v1   ;;  %v68_v4 = vld [vmem:[%s403_s0 + $0x8] sm:$0xff]  ;;  %v134_v11 = vlaneseq  ;;  %v326_v21 = vmov 0.0   ;;  %vm60_vm3 = vcmask 7168   ;;  %s327_s0 = smov [#allocation5]  }
   0x4   :  { %286 = vset.pattern.permute.xlu0 %v325_v2  ;;  %v73_v5 = vsel %vm69_vm0, %v68_v4, -inf  ;;  %v133_v6 = vld [vmem:[%s404_s1 + $0x8] sm:$0xff]  ;;  %62 = vst.msk [vmem:[#allocation2 + $0x8] sm:$0xff] %vm60_vm3, %v326_v21  ;;  %s254_s1 = sshll.u32 %s327_s0, 4  ;;  %s256_s19 = sshll.u32 %s405_s2, 4  ;;  %s255_s1 = int_to_ptr.vmem [resolvable:$true] %s254_s1  ;;  %s257_s19 = int_to_ptr.hbm [resolvable:$true] %s256_s19 }
   0x5   :  { %v358_v15 = vand.u32 127, %v134_v11  ;;  %64 = vst.msk [vmem:[#allocation3 + $0x8] sm:$0xff] %vm60_vm3, %v326_v21 }
   0x6   :  { %66 = vst.msk [vmem:[#allocation4 + $0x8] sm:$0xff] %vm60_vm3, %v326_v21 }
   0x7   :  { %61 = vst.msk [vmem:[#allocation2] sm:$0xff] %vm60_vm3, %v326_v21  ;;  %vm228_vm15 = vcmp.eq.s32.totalorder %v358_v15, 2 }
   0x8   :  { %63 = vst.msk [vmem:[#allocation3] sm:$0xff] %vm60_vm3, %v326_v21 }
   0x9   :  { %65 = vst.msk [vmem:[#allocation4] sm:$0xff] %vm60_vm3, %v326_v21 }
   0xb   :  { %74 = vmax.xlane.f32.xlu0 %v73_v5  ;;  %140 = vperm.xlu1 %284, %v133_v6   ;;  %v165_v61 = vld [vmem:[#allocation2 + $0x8] sm:$0xff] }
   0xd   :  { %v180_v39 = vld [vmem:[#allocation4 + $0x8] sm:$0xff] }
   0xe   :  { %v164_v54 = vld [vmem:[#allocation2] sm:$0xff] }
  0x10   :  { %v179_v55 = vld [vmem:[#allocation4] sm:$0xff] }
  0x75   :  { %v138_v7 = vpop.permute.xlu1 %137 }
  0x76   :  { %v72_v8 = vpop.xlane.xlu0 %71  ;;  %vm142_vm2 = vcmp.eq.s32.totalorder %v358_v15, %v138_v7  ;;  %v171_v7 = vld [vmem:[#allocation3] sm:$0xff] }
  0x77   :  { %v76_v9 = vsub.f32 %v67_v0, %v72_v8  ;;  %v277_v27 = vsel %vm142_vm2, 1.0, %v326_v21 }
  0x79   :  { %v78_v10 = vmul.f32 1.442695, %v76_v9  ;;  %v148_v30 = vmul.f32 %v277_v27, %v76_v9 }
  0x7b   :  { %287 = vpow2.f32 %v78_v10  ;;  %v150_v31 = vsel %vm69_vm0, %v148_v30, 0.0 }
  0x7d   :  { %v141_v13 = vpop.permute.xlu1 %140 }
  0x7e   :  { %v75_v12 = vpop.xlane.xlu0 %74  ;;  %vm143_vm1 = vcmp.eq.s32.totalorder %v358_v15, %v141_v13 }
  0x7f   :  { %v77_v14 = vsub.f32 %v68_v4, %v75_v12  ;;  %v278_v22 = vsel %vm143_vm1, 1.0, %v326_v21  ;;  %vm224_vm1 = vcmp.eq.s32.totalorder %v358_v15, 0 }
  0x81   :  { %v288_v16 = vpop.eup %287  ;;  %v80_v17 = vmul.f32 1.442695, %v77_v14  ;;  %v149_v23 = vmul.f32 %v278_v22, %v77_v14 }
  0x82   :  { %v82_v18 = vsel %vm69_vm0, %v288_v16, 0.0  ;;  %v92_v19 = vmul.f32 %v288_v16, %v76_v9 }
  0x83   :  { %289 = vpow2.f32 %v80_v17  ;;  %83 = vadd.xlane.f32.xlu2 %v82_v18  ;;  %v153_v29 = vsel %vm69_vm0, %v149_v23, 0.0 }
  0x84   :  { %v94_v20 = vsel %vm69_vm0, %v92_v19, 0.0 }
  0x85   :  { %95 = vadd.xlane.f32.xlu0 %v94_v20 }
  0x89   :  { %v290_v24 = vpop.eup %289 }
  0x8a   :  { %v85_v25 = vsel %vm69_vm0, %v290_v24, 0.0  ;;  %v93_v26 = vmul.f32 %v290_v24, %v77_v14 }
  0x8b   :  { %86 = vadd.xlane.f32.xlu2 %v85_v25 }
  0x8c   :  { %v97_v28 = vsel %vm69_vm0, %v93_v26, 0.0  ;;  %vm226_vm0 = vcmp.eq.s32.totalorder %v358_v15, 1 }
  0x8d   :  { %98 = vadd.xlane.f32.xlu1 %v97_v28  ;;  %154 = vadd.xlane.f32.xlu0 %v153_v29 }
  0x93   :  { %151 = vadd.xlane.f32.xlu2 %v150_v31 }
  0xf6   :  { %v84_v32 = vpop.xlane.xlu2 %83 }
  0xf7   :  { %291 = vrcp.f32 %v84_v32  ;;  %v111_v40 = vand.u32 2147483648, %v84_v32  ;;  %v109_v43 = vand.u32 2147483647, %v84_v32  ;;  %vm105_vm6 = vweird.f32 %v84_v32 }
  0xf8   :  { %v96_v33 = vpop.xlane.xlu0 %95  ;;  %293 = vlog2.f32 %v84_v32 }
  0xf9   :  { %v112_v49 = vor.u32 1.1754944e-38, %v111_v40  ;;  %vm110_vm8 = vcmp.eq.f32.partialorder %v109_v43, 8.507059e+37 }
  0xfd   :  { %v292_v34 = vpop.eup %291 }
  0xfe   :  { %v101_v35 = vmul.f32 %v292_v34, %v84_v32  ;;  %v87_v36 = vpop.xlane.xlu2 %86  ;;  %v294_v41 = vpop.eup %293  ;;  %vm106_vm5 = vweird.f32 %v292_v34 }
  0xff   :  { %295 = vrcp.f32 %v87_v36  ;;  %v89_v48 = vmul.f32 0.6931472, %v294_v41  ;;  %vm107_vm7 = vmor %vm105_vm6, %vm106_vm5  ;;  %v126_v63 = vand.u32 2147483648, %v87_v36  ;;  %v124_v5 = vand.u32 2147483647, %v87_v36 }
 0x100   :  { %v102_v37 = vsub.f32 1.0, %v101_v35  ;;  %297 = vlog2.f32 %v87_v36  ;;  %v155_v38 = vpop.xlane.xlu0 %154  ;;  %vm120_vm11 = vweird.f32 %v87_v36  ;;  %v99_v14 = vpop.xlane.xlu1 %98 }
 0x101   :  { %vm159_vm4 = vcmp.lt.f32.partialorder %v155_v38, 0.0  ;;  %v127_v10 = vor.u32 1.1754944e-38, %v126_v63  ;;  %vm125_vm13 = vcmp.eq.f32.partialorder %v124_v5, 8.507059e+37 }
 0x102   :  { %v103_v42 = vmul.f32 %v292_v34, %v102_v37  ;;  %v280_v44 = vsel %vm159_vm4, 1.0, %v326_v21 }
 0x103   :  { %v182_v45 = vadd.f32 %v280_v44, %v180_v39 }
 0x104   :  { %v104_v46 = vadd.f32 %v292_v34, %v103_v42 }
 0x105   :  { %v296_v47 = vpop.eup %295  ;;  %184 = vst.msk [vmem:[#allocation4 + $0x8] sm:$0xff] %vm60_vm3, %v182_v45 }
 0x106   :  { %v298_v50 = vpop.eup %297  ;;  %v108_v51 = vsel %vm107_vm7, %v292_v34, %v104_v46  ;;  %v116_v52 = vmul.f32 %v296_v47, %v87_v36  ;;  %v152_v53 = vpop.xlane.xlu2 %151  ;;  %vm121_vm10 = vweird.f32 %v296_v47 }
 0x107   :  { %v113_v56 = vsel %vm110_vm8, %v112_v49, %v108_v51  ;;  %v91_v57 = vmul.f32 0.6931472, %v298_v50  ;;  %v156_v58 = vsub.f32 %v89_v48, %v152_v53  ;;  %vm158_vm9 = vcmp.lt.f32.partialorder %v152_v53, 0.0  ;;  %vm122_vm12 = vmor %vm120_vm11, %vm121_vm10 }
 0x108   :  { %v114_v59 = vmul.f32 %v113_v56, %v96_v33  ;;  %v117_v60 = vsub.f32 1.0, %v116_v52  ;;  %v279_v62 = vsel %vm158_vm9, 1.0, %v326_v21  ;;  %v172_v21 = vld [vmem:[#allocation3 + $0x8] sm:$0xff] }
 0x109   :  { %v157_v0 = vsub.f32 %v91_v57, %v155_v38  ;;  %v166_v1 = vadd.f32 %v164_v54, %v156_v58  ;;  %v181_v2 = vadd.f32 %v279_v62, %v179_v55  ;;  %v222_v55 = vshrl.u32 %v134_v11, 7 }
 0x10a   :  { %v130_v3 = vsub.f32 %v89_v48, %v114_v59  ;;  %v118_v4 = vmul.f32 %v296_v47, %v117_v60 }
 0x10b   :  { %v167_v6 = vadd.f32 %v165_v61, %v157_v0  ;;  %169 = vst.msk [vmem:[#allocation2] sm:$0xff] %vm60_vm3, %v166_v1  ;;  %vm223_vm14 = vcmp.eq.s32.totalorder %v222_v55, 0 }
 0x10c   :  { %v119_v8 = vadd.f32 %v296_v47, %v118_v4  ;;  %v173_v9 = vmul.f32 %v279_v62, %v130_v3  ;;  %183 = vst.msk [vmem:[#allocation4] sm:$0xff] %vm60_vm3, %v181_v2  ;;  %v211_v18 = vld [vmem:[#allocation4 + $0x8] sm:$0xff]  ;;  %vm229_vm2 = vmand %vm223_vm14, %vm228_vm15 }
 0x10d   :  { %170 = vst.msk [vmem:[#allocation2 + $0x8] sm:$0xff] %vm60_vm3, %v167_v6  ;;  %v213_v26 = vsel %vm60_vm3, %v211_v18, 0.0  ;;  %vm225_vm4 = vmand %vm223_vm14, %vm224_vm1 }
 0x10e   :  { %v123_v12 = vsel %vm122_vm12, %v296_v47, %v119_v8  ;;  %v175_v13 = vadd.f32 %v173_v9, %v171_v7 }
 0x10f   :  { %v128_v16 = vsel %vm125_vm13, %v127_v10, %v123_v12 }
 0x110   :  { %v129_v17 = vmul.f32 %v128_v16, %v99_v14  ;;  %177 = vst.msk [vmem:[#allocation3] sm:$0xff] %vm60_vm3, %v175_v13 }
 0x112   :  { %v131_v19 = vsub.f32 %v91_v57, %v129_v17  ;;  %v188_v20 = vld [vmem:[#allocation2] sm:$0xff] }
 0x113   :  { %v210_v22 = vld [vmem:[#allocation4] sm:$0xff]  ;;  %v190_v23 = vsel %vm60_vm3, %v188_v20, 0.0 }
 0x114   :  { %v174_v24 = vmul.f32 %v280_v44, %v131_v19  ;;  %v212_v25 = vsel %vm60_vm3, %v210_v22, 0.0  ;;  %v189_v27 = vld [vmem:[#allocation2 + $0x8] sm:$0xff] }
 0x115   :  { %v214_v28 = vadd.f32 %v213_v26, %v212_v25  ;;  %v191_v29 = vsel %vm60_vm3, %v189_v27, 0.0 }
 0x116   :  { %v176_v30 = vadd.f32 %v174_v24, %v172_v21  ;;  %v192_v31 = vadd.f32 %v191_v29, %v190_v23 }
 0x117   :  { %v215_v32 = vrot.slane %v214_v28, 4  ;;  %v199_v39 = vld [vmem:[#allocation3] sm:$0xff] }
 0x118   :  { %178 = vst.msk [vmem:[#allocation3 + $0x8] sm:$0xff] %vm60_vm3, %v176_v30  ;;  %v193_v33 = vrot.slane %v192_v31, 4  ;;  %v201_v42 = vsel %vm60_vm3, %v199_v39, 0.0 }
 0x119   :  { %v216_v34 = vadd.f32 %v215_v32, %v214_v28 }
 0x11a   :  { %v194_v35 = vadd.f32 %v193_v33, %v192_v31 }
 0x11b   :  { %v217_v36 = vrot.slane %v216_v34, 2 }
 0x11c   :  { %v195_v38 = vrot.slane %v194_v35, 2 }
 0x11d   :  { %v218_v37 = vadd.f32 %v217_v36, %v216_v34 }
 0x11e   :  { %v196_v45 = vadd.f32 %v195_v38, %v194_v35 }
 0x11f   :  { %v219_v40 = vrot.slane %v218_v37, 1  ;;  %v200_v41 = vld [vmem:[#allocation3 + $0x8] sm:$0xff] }
 0x120   :  { %v202_v43 = vsel %vm60_vm3, %v200_v41, 0.0  ;;  %v197_v48 = vrot.slane %v196_v45, 1  ;;  %vm227_vm3 = vmand %vm223_vm14, %vm226_vm0 }
 0x121   :  { %v220_v44 = vadd.f32 %v219_v40, %v218_v37  ;;  %v203_v46 = vadd.f32 %v202_v43, %v201_v42 }
 0x122   :  { %v198_v51 = vadd.f32 %v197_v48, %v196_v45 }
 0x123   :  { %232 = vperm.xlu2 %285, %v220_v44   ;;  %v204_v47 = vrot.slane %v203_v46, 4 }
 0x125   :  { %v205_v49 = vadd.f32 %v204_v47, %v203_v46 }
 0x127   :  { %v206_v50 = vrot.slane %v205_v49, 2 }
 0x129   :  { %v207_v52 = vadd.f32 %v206_v50, %v205_v49 }
 0x12b   :  { %244 = vperm.xlu2 %285, %v198_v51   ;;  %v208_v53 = vrot.slane %v207_v52, 1 }
 0x12d   :  { %v209_v54 = vadd.f32 %v208_v53, %v207_v52 }
 0x12f   :  { %238 = vperm.xlu0 %286, %v209_v54  }
 0x17d   :  { %v233_v56 = vpop.permute.xlu2 %232 }
 0x17e   :  { %v235_v57 = vsel %vm229_vm2, %v233_v56, 0.0 }
 0x185   :  { %v245_v11 = vpop.permute.xlu2 %244 }
 0x1a1   :  { %v239_v58 = vpop.permute.xlu0 %238 }
 0x1a2   :  { %v241_v59 = vsel %vm227_vm3, %v239_v58, %v235_v57 }
 0x1a3   :  { %v247_v60 = vsel %vm225_vm4, %v245_v11, %v241_v59 }
 0x1a4   :  { %248 = vst [vmem:[#allocation5] sm:$0xff] %v247_v60 }
 0x1a5   :  { %259 = dma.vmem_to_hbm [thread:$0]  %s255_s1, 128, %s257_s19, [#allocation6]  }
 0x1a6   :  { %323 = dma.done.wait [#allocation6], 128  }
 0x1a7   :  { %324 = vsyncadd [#allocation6], 4294967168 }
 0x1a8   :  { %264 = vsyncpa [#allocation6], 1 }

</bundles_post_ra>
